<compile_context>
chip_gen: v5e
topology: v5e:2x2
jax: 0.10.0
libtpu: 0.0.40
codegen_flags: <defaults>
</compile_context>

<pallas_src>
import math

import jax
import jax.numpy as jnp
from jax.experimental import pallas as pl
from jax.experimental.pallas import tpu as pltpu

K = 7          # conv kernel size
PAD = 3        # conv padding
ROWS = 32      # output rows per inner chunk in the conv kernel


def _round_up(v, m):
    return ((v + m - 1) // m) * m


def _vmem_defaults():
    """(stage-1 input-block budget, scoped vmem limit) — generation aware."""
    cap = None
    try:
        cap = getattr(pltpu.get_tpu_info(), "vmem_capacity_bytes", None)
    except Exception:
        cap = None
    if cap is None:
        cap = 64 * 1024 * 1024                       # conservative (v7x-sized)
    if cap >= 100 * 1024 * 1024:                     # v5e / v6e: 128 MiB physical
        return 40 * 1024 * 1024, 96 * 1024 * 1024
    return 20 * 1024 * 1024, 48 * 1024 * 1024        # v7x: 64 MiB physical


def _choose_hw_tile(HW, max_tile=8192):
    """Largest multiple-of-128 divisor of H*W that is <= max_tile (or full HW)."""
    if HW <= max_tile:
        return HW
    start = max_tile - (max_tile % 128)
    for t in range(start, 127, -128):
        if HW % t == 0:
            return t
    return HW   # awkward HW with no 128-multiple divisor: use the full dim


def _choose_c_tile(C, hw_tile, itemsize, budget_bytes):
    """Largest channel tile whose double-buffered input block fits the budget.

    Always returns a multiple of 8 or the full C, so the block's second-to-last
    dim satisfies the (8,128) tiling rule; budget uses the input dtype size."""
    per_channel = hw_tile * itemsize * 2             # double-buffered
    target = max(1, budget_bytes // per_channel)
    if C <= target:
        return C
    t = 8 * (target // 8)
    while t >= 8:
        if C % t == 0:
            return t
        t -= 8
    return C   # no multiple-of-8 divisor fits: full C always satisfies the rule


def _choose_nb(N, per_image_bytes, h_chunks):
    """Images per conv grid step: amortize per-step overhead, keep >=2 steps
    (two v7x TensorCores), bound VMEM and unrolled trace size."""
    best = 1
    for t in range(1, min(N, 8) + 1):
        if N % t:
            continue
        if t * per_image_bytes > 8 * 1024 * 1024:
            continue
        if t * h_chunks > 16:
            continue
        if t > 1 and N // t < 2:
            continue
        best = t
    return best


def spatial_attention(x, weight, bias, *, c_tile=None, hw_tile=None,
                      vmem_budget_bytes=None, vmem_limit_bytes=None):
    """x: (N, C, H, W).  weight: (1, 2, 7, 7).  bias: (1,).  -> (N, 1, H, W) f32."""
    N, C, H, W = x.shape
    HW = H * W

    budget_d, limit_d = _vmem_defaults()
    if vmem_budget_bytes is None:
        vmem_budget_bytes = budget_d
    if vmem_limit_bytes is None:
        vmem_limit_bytes = limit_d

    w_flat = weight.reshape(-1).astype(jnp.float32)      # (2*49,) -> SMEM
    b = bias.astype(jnp.float32)                         # (1,)    -> SMEM
    x2 = x.reshape(N, C, HW)                             # free, contiguous

    if hw_tile is None:
        hw_tile = _choose_hw_tile(HW)
    assert HW % hw_tile == 0
    n_hw = HW // hw_tile
    if c_tile is None:
        c_tile = _choose_c_tile(C, hw_tile, x.dtype.itemsize, vmem_budget_bytes)
    assert C % c_tile == 0
    n_c = C // c_tile
    inv_c = 1.0 / C

    # ------------- Stage 1: channel mean / max (lane-dense over H*W) ----------
    # Accumulate straight into the grid-resident (1, 2, hw_tile) output block:
    # row 0 = running sum (scaled by 1/C on the last c step), row 1 = running max.
    def reduce_kernel(x_ref, o_ref):
        c_idx = pl.program_id(2)
        xb = x_ref[0].astype(jnp.float32)                # (c_tile, hw_tile)
        part_sum = jnp.sum(xb, axis=0, keepdims=True)    # (1, hw_tile)
        part_max = jnp.max(xb, axis=0, keepdims=True)

        @pl.when(c_idx == 0)
        def _():
            o_ref[0, 0:1, :] = part_sum
            o_ref[0, 1:2, :] = part_max

        @pl.when(c_idx > 0)
        def _():
            o_ref[0, 0:1, :] = o_ref[0, 0:1, :] + part_sum
            o_ref[0, 1:2, :] = jnp.maximum(o_ref[0, 1:2, :], part_max)

        @pl.when(c_idx == n_c - 1)
        def _():
            o_ref[0, 0:1, :] = o_ref[0, 0:1, :] * inv_c

    am = pl.pallas_call(
        reduce_kernel,
        out_shape=jax.ShapeDtypeStruct((N, 2, HW), jnp.float32),
        grid_spec=pltpu.PrefetchScalarGridSpec(
            num_scalar_prefetch=0,
            grid=(N, n_hw, n_c),                         # reduction (C) axis last
            in_specs=[
                pl.BlockSpec((1, c_tile, hw_tile), lambda n, h, c: (n, c, h)),
            ],
            out_specs=pl.BlockSpec((1, 2, hw_tile), lambda n, h, c: (n, 0, h)),
        ),
        compiler_params=pltpu.CompilerParams(
            dimension_semantics=("parallel", "parallel", "arbitrary"),
            vmem_limit_bytes=vmem_limit_bytes,
        ),
    )(x2)

    # ------------- Stage 2: 7x7 conv (2 -> 1 ch) + sigmoid --------------------
    Hpad = H + 2 * PAD                                   # exact padded height
    Wout = _round_up(W, 128)                             # lane-dense output width
    Wp = Wout + 128                                      # room for Wout + 6 taps

    # Pre-pad the planes in the wrapper (XLA pad on the tiny intermediate): the
    # kernel then needs no lane-offset relayouts and its input DMA is lane-dense.
    planes = am.reshape(N, 2, H, W)
    planes = jnp.pad(planes, ((0, 0), (0, 0), (PAD, PAD), (PAD, Wp - W - PAD)))

    h_chunks = -(-H // ROWS)
    per_image = (2 * Hpad * Wp + H * Wout) * 4 * 2       # in + out, double-buffered
    NB = _choose_nb(N, per_image, h_chunks)

    def conv_kernel(w_ref, b_ref, p_ref, o_ref):
        # p_ref: (NB, 2, Hpad, Wp)   o_ref: (NB, H, Wout)
        bias_s = b_ref[0]
        for bi in range(NB):
            for r0 in range(0, H, ROWS):                 # bound live vregs at large H
                rc = min(ROWS, H - r0)
                acc = jnp.zeros((rc, Wout), jnp.float32)
                for c in range(2):
                    for dj in range(K):
                        # One hoisted column (lane) shift per (plane, dj).
                        col = p_ref[bi, c, pl.ds(r0, rc + K - 1), pl.ds(dj, Wout)]
                        # Hoist the 7 SMEM weight scalars of this column only.
                        wcol = [w_ref[c * K * K + di * K + dj] for di in range(K)]
                        for di in range(K):
                            acc = acc + wcol[di] * jax.lax.slice(
                                col, (di, 0), (di + rc, Wout))
                # Lane-dense (Wout multiple of 128) unmasked store.
                o_ref[bi, pl.ds(r0, rc), :] = jax.nn.sigmoid(acc + bias_s)

    out = pl.pallas_call(
        conv_kernel,
        out_shape=jax.ShapeDtypeStruct((N, H, Wout), jnp.float32),
        grid_spec=pltpu.PrefetchScalarGridSpec(
            num_scalar_prefetch=0,
            grid=(N // NB,),
            in_specs=[
                pl.BlockSpec(memory_space=pltpu.MemorySpace.SMEM),   # weights
                pl.BlockSpec(memory_space=pltpu.MemorySpace.SMEM),   # bias
                pl.BlockSpec((NB, 2, Hpad, Wp), lambda n: (n, 0, 0, 0)),
            ],
            out_specs=pl.BlockSpec((NB, H, Wout), lambda n: (n, 0, 0)),
        ),
        compiler_params=pltpu.CompilerParams(
            dimension_semantics=("parallel",),
            vmem_limit_bytes=vmem_limit_bytes,
        ),
    )(w_flat, b, planes)

    if Wout != W:
        out = out[:, :, :W]
    return out.reshape(N, 1, H, W)


def _reference(x, weight, bias):
    avg = jnp.mean(x, axis=1, keepdims=True)
    mx = jnp.max(x, axis=1, keepdims=True)
    cat = jnp.concatenate([avg, mx], axis=1)             # (N,2,H,W)
    out = jax.lax.conv_general_dilated(
        cat, weight, window_strides=(1, 1), padding=((PAD, PAD), (PAD, PAD)),
        dimension_numbers=("NCHW", "OIHW", "NCHW"))
    return jax.nn.sigmoid(out + bias.reshape(1, 1, 1, 1))


if __name__ == "__main__":
    key = jax.random.PRNGKey(0)
    kx, kw, kb = jax.random.split(key, 3)

    N, C, H, W = 2, 4, 16, 16
    x = jax.random.normal(kx, (N, C, H, W), dtype=jnp.float32)

    # deterministic parameter init (kaiming-uniform-like bound, fixed keys)
    fan_in = 2 * K * K
    bound = 1.0 / math.sqrt(fan_in)
    weight = jax.random.uniform(kw, (1, 2, K, K), jnp.float32, -bound, bound)
    bias = jax.random.uniform(kb, (1,), jnp.float32, -bound, bound)

    out = spatial_attention(x, weight, bias)
    out = jax.block_until_ready(out)

    ref = _reference(x, weight, bias)
    assert out.shape == (N, 1, H, W)
    assert jnp.allclose(out, ref, atol=1e-5, rtol=1e-5), "mismatch vs reference"

    print("KERNEL_OK")
</pallas_src>

<mosaic_0001>
module attributes {stable_mosaic.version = 11 : i64} {
  func.func @reduce_kernel(%arg0: i32, %arg1: i32, %arg2: i32, %arg3: memref<1x4x256xf32, #tpu.memory_space<vmem>>, %arg4: memref<1x2x256xf32, #tpu.memory_space<vmem>>) attributes {dimension_semantics = [#tpu.dimension_semantics<parallel>, #tpu.dimension_semantics<parallel>, #tpu.dimension_semantics<arbitrary>], iteration_bounds = array<i64: 2, 1, 1>, scalar_prefetch = 0 : i64, scratch_operands = 0 : i64, tpu.core_type = #tpu.core_type<tc>, window_params = [{transform_indices = @transform_0, window_bounds = array<i64: 1, 4, 256>}, {transform_indices = @transform_1, window_bounds = array<i64: 1, 2, 256>}]} {
    %c0 = arith.constant 0 : index
    %c0_0 = arith.constant 0 : index
    %c0_1 = arith.constant 0 : index
    %0 = vector.load %arg3[%c0, %c0_0, %c0_1] : memref<1x4x256xf32, #tpu.memory_space<vmem>>, vector<1x4x256xf32>
    %1 = vector.shape_cast %0 : vector<1x4x256xf32> to vector<4x256xf32>
    %cst = arith.constant dense<0.000000e+00> : vector<256xf32>
    %2 = vector.multi_reduction <add>, %1, %cst [0] : vector<4x256xf32> to vector<256xf32>
    %3 = vector.shape_cast %2 : vector<256xf32> to vector<1x256xf32>
    %cst_2 = arith.constant dense<0xFF800000> : vector<256xf32>
    %4 = vector.multi_reduction <maximumf>, %1, %cst_2 [0] : vector<4x256xf32> to vector<256xf32>
    %5 = vector.shape_cast %4 : vector<256xf32> to vector<1x256xf32>
    %c0_i32 = arith.constant 0 : i32
    %6 = arith.cmpi eq, %arg2, %c0_i32 : i32
    %7 = arith.extui %6 : i1 to i32
    %c0_i32_3 = arith.constant 0 : i32
    %8 = arith.cmpi ne, %7, %c0_i32_3 : i32
    scf.if %8 {
      %c0_8 = arith.constant 0 : index
      %c0_9 = arith.constant 0 : index
      %c0_10 = arith.constant 0 : index
      %15 = vector.load %arg4[%c0_8, %c0_9, %c0_10] : memref<1x2x256xf32, #tpu.memory_space<vmem>>, vector<1x1x256xf32>
      %16 = vector.shape_cast %15 : vector<1x1x256xf32> to vector<1x256xf32>
      %17 = vector.shape_cast %3 : vector<1x256xf32> to vector<1x1x256xf32>
      tpu.vector_store %arg4[%c0_8, %c0_9, %c0_10], %17 {strides = array<i32>} : memref<1x2x256xf32, #tpu.memory_space<vmem>>, vector<1x1x256xf32>,
      %c0_11 = arith.constant 0 : index
      %c1 = arith.constant 1 : index
      %c0_12 = arith.constant 0 : index
      %18 = vector.load %arg4[%c0_11, %c1, %c0_12] : memref<1x2x256xf32, #tpu.memory_space<vmem>>, vector<1x1x256xf32>
      %19 = vector.shape_cast %18 : vector<1x1x256xf32> to vector<1x256xf32>
      %20 = vector.shape_cast %5 : vector<1x256xf32> to vector<1x1x256xf32>
      tpu.vector_store %arg4[%c0_11, %c1, %c0_12], %20 {strides = array<i32>} : memref<1x2x256xf32, #tpu.memory_space<vmem>>, vector<1x1x256xf32>,
    } else {
    }
    %c0_i32_4 = arith.constant 0 : i32
    %9 = arith.cmpi sgt, %arg2, %c0_i32_4 : i32
    %10 = arith.extui %9 : i1 to i32
    %c0_i32_5 = arith.constant 0 : i32
    %11 = arith.cmpi ne, %10, %c0_i32_5 : i32
    scf.if %11 {
      %c0_8 = arith.constant 0 : index
      %c0_9 = arith.constant 0 : index
      %c0_10 = arith.constant 0 : index
      %15 = vector.load %arg4[%c0_8, %c0_9, %c0_10] : memref<1x2x256xf32, #tpu.memory_space<vmem>>, vector<1x1x256xf32>
      %16 = vector.shape_cast %15 : vector<1x1x256xf32> to vector<1x256xf32>
      %17 = arith.addf %16, %3 : vector<1x256xf32>
      %c0_11 = arith.constant 0 : index
      %c0_12 = arith.constant 0 : index
      %c0_13 = arith.constant 0 : index
      %18 = vector.load %arg4[%c0_11, %c0_12, %c0_13] : memref<1x2x256xf32, #tpu.memory_space<vmem>>, vector<1x1x256xf32>
      %19 = vector.shape_cast %18 : vector<1x1x256xf32> to vector<1x256xf32>
      %20 = vector.shape_cast %17 : vector<1x256xf32> to vector<1x1x256xf32>
      tpu.vector_store %arg4[%c0_11, %c0_12, %c0_13], %20 {strides = array<i32>} : memref<1x2x256xf32, #tpu.memory_space<vmem>>, vector<1x1x256xf32>,
      %c0_14 = arith.constant 0 : index
      %c1 = arith.constant 1 : index
      %c0_15 = arith.constant 0 : index
      %21 = vector.load %arg4[%c0_14, %c1, %c0_15] : memref<1x2x256xf32, #tpu.memory_space<vmem>>, vector<1x1x256xf32>
      %22 = vector.shape_cast %21 : vector<1x1x256xf32> to vector<1x256xf32>
      %23 = arith.maximumf %22, %5 : vector<1x256xf32>
      %c0_16 = arith.constant 0 : index
      %c1_17 = arith.constant 1 : index
      %c0_18 = arith.constant 0 : index
      %24 = vector.load %arg4[%c0_16, %c1_17, %c0_18] : memref<1x2x256xf32, #tpu.memory_space<vmem>>, vector<1x1x256xf32>
      %25 = vector.shape_cast %24 : vector<1x1x256xf32> to vector<1x256xf32>
      %26 = vector.shape_cast %23 : vector<1x256xf32> to vector<1x1x256xf32>
      tpu.vector_store %arg4[%c0_16, %c1_17, %c0_18], %26 {strides = array<i32>} : memref<1x2x256xf32, #tpu.memory_space<vmem>>, vector<1x1x256xf32>,
    } else {
    }
    %c0_i32_6 = arith.constant 0 : i32
    %12 = arith.cmpi eq, %arg2, %c0_i32_6 : i32
    %13 = arith.extui %12 : i1 to i32
    %c0_i32_7 = arith.constant 0 : i32
    %14 = arith.cmpi ne, %13, %c0_i32_7 : i32
    scf.if %14 {
      %c0_8 = arith.constant 0 : index
      %c0_9 = arith.constant 0 : index
      %c0_10 = arith.constant 0 : index
      %15 = vector.load %arg4[%c0_8, %c0_9, %c0_10] : memref<1x2x256xf32, #tpu.memory_space<vmem>>, vector<1x1x256xf32>
      %16 = vector.shape_cast %15 : vector<1x1x256xf32> to vector<1x256xf32>
      %cst_11 = arith.constant 2.500000e-01 : f32
      %17 = vector.broadcast %cst_11 : f32 to vector<1x256xf32>
      %18 = arith.mulf %16, %17 : vector<1x256xf32>
      %c0_12 = arith.constant 0 : index
      %c0_13 = arith.constant 0 : index
      %c0_14 = arith.constant 0 : index
      %19 = vector.load %arg4[%c0_12, %c0_13, %c0_14] : memref<1x2x256xf32, #tpu.memory_space<vmem>>, vector<1x1x256xf32>
      %20 = vector.shape_cast %19 : vector<1x1x256xf32> to vector<1x256xf32>
      %21 = vector.shape_cast %18 : vector<1x256xf32> to vector<1x1x256xf32>
      tpu.vector_store %arg4[%c0_12, %c0_13, %c0_14], %21 {strides = array<i32>} : memref<1x2x256xf32, #tpu.memory_space<vmem>>, vector<1x1x256xf32>,
    } else {
    }
    return
  }
  func.func @transform_0(%arg0: i32, %arg1: i32, %arg2: i32) -> (i32, i32, i32) {
    %c0_i32 = arith.constant 0 : i32
    return %arg0, %arg2, %arg1 : i32, i32, i32
  }
  func.func @transform_1(%arg0: i32, %arg1: i32, %arg2: i32) -> (i32, i32, i32) {
    %c0_i32 = arith.constant 0 : i32
    %c0_i32_0 = arith.constant 0 : i32
    return %arg0, %c0_i32, %arg1 : i32, i32, i32
  }
}

</mosaic_0001>

<bundles_post_ra>
// kernel: tpu_custom_call.1
= control target key start
LH: loop header
LB: loop body
LE: loop exit
PB: predicated region body
PF: predicated region fallthrough
CT: control target
= control target key end

     0   :  { %6 = vsyncpa [#allocation3], 0  ;;  %s716_s0 = inlined_call_operand.hbm [shape: f32[2,4,256], index: 0, kind: input, shape index: {}]   ;;  %s717_s1 = inlined_call_operand.hbm [shape: f32[2,2,256], index: 1, kind: output, shape index: {}]  }
   0x1   :  { %8 = vsyncpa [#allocation3 + $0x1], 0 }
   0x2   :  { %9 = vsyncpa [#allocation4], 0 }
   0x3   :  { %11 = vsyncpa [#allocation4 + $0x1], 0  ;;  %s579_s6 = smov 0   ;;  %s581_s7 = smov 0  }
   0x4   :  { %s583_s8 = smov 0   ;;  %s585_s9 = smov 0  }
   0x5   :  { %s587_s10 = smov 0   ;;  %s589_s11 = smov 0  }
   0x6 LB: > { %s373_s12 = sadd.s32 4294967295, %s567_s11   ;;  %s374_s13 = sadd.s32 4294967294, %s567_s11   ;;  %s567_s11 = sphi %s589_s11, %s17_s11   ;;  %s563_s10 = sphi %s587_s10, %s728_s10   ;;  %s559_s9 = sphi %s585_s9, %s727_s9   ;;  %s555_s8 = sphi %s583_s8, %s726_s8   ;;  %s551_s7 = sphi %s581_s7, %s725_s7   ;;  %s547_s6 = sphi %s579_s6, %s724_s6  }
   0x7   : > { %s36_s14 = sadd.s32 1, %s563_s10  ;;  %s47_s15 = sadd.s32 1, %s555_s8 }
   0x8   : > { %p38_p0 = scmp.ge.s32.totalorder %s36_s14, 2  ;;  %p54_p1 = scmp.ne.s32.totalorder %s555_s8, %s551_s7 }
   0x9   : > { %p55_p2 = scmp.eq.s32.totalorder %s567_s11, 0  ;;  %p60_p3 = scmp.ne.s32.totalorder %s551_s7, %s547_s6 }
   0xa   : > { %s730_s14 = smov (%p38_p0, %s36_s14), 0  ;;  %p61_p5 = scmp.eq.s32.totalorder %s373_s12, 0 }
   0xb   : > { %p620_p4 = por %p55_p2, %p54_p1  ;;  %s40_s17 = ssub.s32 %s563_s10, %s730_s14 }
   0xc   : > { %p86_p6 = scmp.eq.s32.totalorder %s373_s12, 1  ;;  %p45_p7 = scmp.eq.s32.totalorder %s40_s17, 0 }
   0xd   : > { %p626_p8 = por %p61_p5, %p60_p3  ;;  %p92_p10 = scmp.eq.s32.totalorder %s374_s13, 1 }
   0xe   : > { %p630_p9 = por %p86_p6, %p54_p1  ;;  %p376_p12 = scmp.ge.s32.totalorder %s567_s11, 2 }
   0xf   : > { %s635_s20 = scalar_select %p45_p7, %s555_s8, %s47_s15  }
  0x10   : > { %p637_p11 = por %p92_p10, %p60_p3  ;;  %p405_p13 = scmp.lt.s32.totalorder %s567_s11, 2 }
  0x11   : > { %s112_s22 = sand.u32 1, %s555_s8   ;;  %s391_s24 = sshll.u32 %s563_s10, 3 }
  0x12   : > { %s377_s23 = sshll.u32 %s112_s22, 3  ;;  %s125_s27 = scalar_lea.hbm %s716_s0, %s391_s24 }
  0x13   : > { %s116_s28 = scalar_lea.vmem [#allocation2], %s377_s23  ;;  %s127_s30 = sshll.u32 %s125_s27, 4  ;;  %s128_s30 = int_to_ptr.hbm [resolvable:$true] %s127_s30 }
  0x14   : > { %s129_s29 = sshll.u32 %s116_s28, 4  ;;  %p398_p0 = pnand %p405_p13, %p620_p4  ;;  %s130_s29 = int_to_ptr.vmem [resolvable:$true] %s129_s29 }
  0x15   : > { %p380_p1 = scmp.ge.s32.totalorder %s567_s11, 1  ;;  %p134_p2 = scmp.lt.s32.totalorder %s567_s11, 3 }
  0x16   : > { %s113_s2 = scalar_lea.sflag [#allocation3], %s112_s22 }
  0x17   : > { %400 = dma.hbm_to_vmem [thread:$0]  (!%p398_p0), %s128_s30, 128, %s130_s29, %s113_s2  }
  0x18   : > { %p135_p3 = pnand %p380_p1, %p134_p2 }
  0x19   : > { %s653_s3 = sand.u32 (!%p135_p3), 1, %s551_s7  }
  0x1a   : > { %138 = sbr.rel (%p135_p3) target bundleno = 70 (0x46), region = 24  ;;  %s381_s4 = sshll.u32 (!%p135_p3), %s653_s3, 3 }
  0x1b   : > { %s141_s5 = scalar_lea.sflag (!%p135_p3), [#allocation3], %s653_s3  ;;  %s144_s12 = scalar_lea.vmem (!%p135_p3), [#allocation2], %s381_s4 }
  0x1f   : > { %538 = dma.done.wait (%p626_p8), %s141_s5, 128  }
  0x20   : > { %540 = vsyncadd (%p626_p8), %s141_s5, 4294967168  ;;  %v166_v0 = vld [vmem:[%s144_s12] sm:$0xff]  ;;  %vm173_vm0 = vcmask 1043456   ;;  %v217_v15 = vlaneseq  ;;  %s382_s13 = sshll.u32 %s653_s3, 2  ;;  %vm214_vm1 = vcmask 1040384   ;;  %s392_s15 = sshll.u32 %s559_s9, 2 }
  0x21   : > { %168 = vst [vmem:[#allocation1] ss:$2 sm:$0xff] %v166_v0  ;;  %s163_s16 = scalar_lea.vmem [#allocation5], %s382_s13  ;;  %s279_s22 = scalar_lea.hbm %s717_s1, %s392_s15 }
  0x22   : > { %vm666_vm2 = vcmp.lt.s32.totalorder %v217_v15, 256  ;;  %s281_s23 = sshll.u32 %s163_s16, 4  ;;  %s283_s24 = sshll.u32 %s279_s22, 4  ;;  %s282_s23 = int_to_ptr.vmem [resolvable:$true] %s281_s23  ;;  %s284_s24 = int_to_ptr.hbm [resolvable:$true] %s283_s24 }
  0x23   : > { %s266_s9 = scalar_lea.sflag [#allocation4], %s653_s3  ;;  %s499_s25 = sshra.s32 %s284_s24, 4  ;;  %s500_s25 = int_to_ptr.hbm [resolvable:$true] %s499_s25 }
  0x24   : > { %s501_s26 = scalar_lea.hbm %s500_s25, 4  ;;  %s505_s29 = scalar_lea.hbm %s717_s1, 8 }
  0x25   : > { %p502_p4 = scmp.ne.s32.totalorder %s500_s25, %s501_s26  ;;  %p506_p7 = scmp.lt.s32.totalorder %s500_s25, %s717_s1 }
  0x26   : > { %p507_p8 = scmp.lt.s32.totalorder %s505_s29, %s501_s26 }
  0x27   : > { %p503_p5 = pnand %p502_p4, %p630_p9 }
  0x28   : > { %v169_v1 = vld.sshfl [vmem:[#allocation1] sm:$0xff pattern:$0x75316420]  ;;  %v170_v2 = vld.sshfl [vmem:[#allocation1 + $0x8] sm:$0xff pattern:$0x75316420]  ;;  %p508_p10 = por %p507_p8, %p506_p7 }
  0x29   : > { %v174_v3 = vsel %vm173_vm0, %v169_v1, 0.0  ;;  %v181_v4 = vsel %vm173_vm0, %v170_v2, 0.0  ;;  %188 = vst [vmem:[#allocation1] ss:$2 sm:$0xff] %v166_v0  ;;  %p504_p6 = pneg %p503_p5 }
  0x2a   : > { %v175_v5 = vrot.slane %v174_v3, 4  ;;  %v182_v6 = vrot.slane %v181_v4, 4 }
  0x2b   : > { %p509_p13 = pnand %p508_p10, %p504_p6 }
  0x2c   : > { %v176_v7 = vadd.f32 %v175_v5, %v174_v3  ;;  %v183_v8 = vadd.f32 %v182_v6, %v181_v4 }
  0x2e   : > { %v177_v9 = vrot.slane %v176_v7, 2  ;;  %v184_v10 = vrot.slane %v183_v8, 2 }
  0x30   : > { %v178_v11 = vadd.f32 %v177_v9, %v176_v7  ;;  %v185_v12 = vadd.f32 %v184_v10, %v183_v8  ;;  %v189_v13 = vld.sshfl [vmem:[#allocation1] sm:$0xff pattern:$0x75316420]  ;;  %v190_v14 = vld.sshfl [vmem:[#allocation1 + $0x8] sm:$0xff pattern:$0x75316420] }
  0x31   : > { %v193_v16 = vsel %vm173_vm0, %v189_v13, -inf  ;;  %v200_v17 = vsel %vm173_vm0, %v190_v14, -inf }
  0x32   : > { %v179_v18 = vrot.slane %v178_v11, 1  ;;  %v186_v19 = vrot.slane %v185_v12, 1  ;;  %v194_v20 = vrot.slane %v193_v16, 4  ;;  %v201_v21 = vrot.slane %v200_v17, 4 }
  0x34   : > { %v187_v22 = vadd.f32 %v186_v19, %v185_v12  ;;  %v195_v23 = vmax.f32 %v193_v16, %v194_v20  ;;  %v202_v24 = vmax.f32 %v200_v17, %v201_v21  ;;  %v180_v26 = vadd.f32 %v179_v18, %v178_v11 }
  0x36   : > { %v213_v27 = vrot.slane %v187_v22, 7  ;;  %v196_v28 = vrot.slane %v195_v23, 2  ;;  %v203_v29 = vrot.slane %v202_v24, 2 }
  0x38   : > { %v215_v30 = vsel %vm214_vm1, %v180_v26, %v213_v27  ;;  %v197_v31 = vmax.f32 %v195_v23, %v196_v28  ;;  %v204_v32 = vmax.f32 %v202_v24, %v203_v29 }
  0x39   : > { %221 = vst.msk [vmem:[%s163_s16] ss:$2 sm:$0x3] %vm666_vm2, %v215_v30 }
  0x3a   : > { %v198_v33 = vrot.slane %v197_v31, 1  ;;  %v205_v34 = vrot.slane %v204_v32, 1 }
  0x3c   : > { %v206_v35 = vmax.f32 %v204_v32, %v205_v34  ;;  %v199_v36 = vmax.f32 %v197_v31, %v198_v33 }
  0x3e   : > { %v224_v37 = vrot.slane %v206_v35, 7 }
  0x40   : > { %v225_v38 = vsel %vm214_vm1, %v199_v36, %v224_v37  ;;  %v258_v39 = vld [vmem:[%s163_s16] ss:$2 sm:$0x3] }
  0x41   : > { %383 = vst.msk [vmem:[%s163_s16 + $0x1] ss:$2 sm:$0x3] %vm666_vm2, %v225_v38  ;;  %v259_v40 = vmul.f32 0.25, %v258_v39 }
  0x43   : > { %264 = vst.msk [vmem:[%s163_s16] ss:$2 sm:$0x3] %vm666_vm2, %v259_v40 }
  0x44   : > { %512 = shalt.err (!%p509_p13)
}
  0x45   : > { %395 = dma.vmem_to_hbm [thread:$0]  (%p630_p9), %s282_s23, 64, %s284_s24, %s266_s9  }
  0x46 PF: > { %s295_s3 = sand.u32 1, %s547_s6   ;;  %p402_p0 = pnand %p376_p12, %p637_p11 }
  0x47   : > { %s296_s4 = scalar_lea.sflag [#allocation4], %s295_s3 }
  0x48   : > { %p403_p1 = pneg %p402_p0 }
  0x4a   : > { %542 = dma.done.wait (%p403_p1), %s296_s4, 64  }
  0x4b   : > { %544 = vsyncadd (%p403_p1), %s296_s4, 4294967232  ;;  %s17_s11 = sadd.s32 1, %s567_s11   ;;  %s724_s6 = smov %s551_s7 }
  0x4c   : > { %p14_p2 = scmp.ge.s32.totalorder %s17_s11, 4   ;;  %s725_s7 = smov %s555_s8 }
  0x4d   : > { %s726_s8 = smov %s635_s20  ;;  %s727_s9 = smov %s563_s10 }
  0x4e   : > { %s728_s10 = smov %s730_s14  ;;  %16 = sbr.rel (!%p14_p2) target bundleno = 6 (0x6), region = 83 }
  0x53   :  { %302 = vsyncpa [#allocation3], 1 }
  0x54   :  { %304 = vsyncpa [#allocation3 + $0x1], 1 }
  0x55   :  { %305 = vsyncpa [#allocation4], 1 }
  0x56   :  { %307 = vsyncpa [#allocation4 + $0x1], 1 }

</bundles_post_ra>
